<compile_context>
chip_gen: v6e
topology: v6e:2x2x1
jax: 0.10.0
libtpu: 0.0.40
codegen_flags: <defaults>
</compile_context>

<pallas_src>
import functools

import jax
import jax.numpy as jnp
import numpy as np
from jax import lax
from jax.experimental import pallas as pl
from jax.experimental.pallas import tpu as pltpu


def _pick_token_tile(seq_len, cap=256):
    """Tokens per grid step. Must divide seq_len; prefer a multiple of 8
    (sublane-full) and keep it modest so double-buffered (TS, H) tiles fit in
    VMEM on every TPU generation (incl. v7x's 64 MiB)."""
    if seq_len <= cap:
        return seq_len
    for ts in range(cap, 7, -1):
        if seq_len % ts == 0 and ts % 8 == 0:
            return ts
    return seq_len


def _pick_chunk(ts):
    """Rows gathered per DMA wave inside a tile; >=2 waves per tile lets the
    next wave's HBM row-gather hide behind the current wave's LayerNorm."""
    for c in (ts // 4, ts // 2, ts):
        if c >= 8 and c % 8 == 0 and ts % c == 0:
            return c
    return ts


def _emb_layernorm_kernel(ids_ref, word_hbm, pos_ref, gamma_ref, beta_ref,
                          out_ref, wbuf, sems, *, eps, ts, chunk):
    # ids_ref:   (B, S) int32 in SMEM (scalar prefetch)
    # word_hbm:  (V, H) in HBM (manual DMA gather)
    # pos_ref:   (ts, H) VMEM block (contiguous rows for this tile)
    # gamma_ref/beta_ref: (1, H) VMEM, resident (constant index_map)
    # out_ref:   (ts, H) VMEM block (leading batch dim squeezed)
    # wbuf:      (2*chunk, H) VMEM scratch, double-buffered gather landing pad
    # sems:      (2*chunk,) DMA semaphores, one per in-flight row copy
    nchunks = ts // chunk
    b = pl.program_id(0)
    t = pl.program_id(1)
    tile_base = t * ts                       # first token of this tile in the sequence

    def start_gather(c, slot):
        """Kick off `chunk` word-embedding row DMAs (HBM -> VMEM) for chunk c."""
        soff = slot * chunk                  # static buffer offset (0 or chunk)
        tok_base = tile_base + c * chunk

        @pl.loop(0, chunk)
        def _(r):
            tok = ids_ref[b, tok_base + r]
            pltpu.make_async_copy(word_hbm.at[tok], wbuf.at[soff + r],
                                  sems.at[soff + r]).start()

    def wait_gather(slot):
        soff = slot * chunk

        @pl.loop(0, chunk)
        def _(r):
            pltpu.make_async_copy(word_hbm.at[0], wbuf.at[soff + r],
                                  sems.at[soff + r]).wait()

    gamma = gamma_ref[...].astype(jnp.float32)     # (1, H)
    beta = beta_ref[...].astype(jnp.float32)

    start_gather(0, 0)                             # prime the gather pipeline
    for c in range(nchunks):                       # static unroll (nchunks is small)
        slot = c % 2
        wait_gather(slot)
        if c + 1 < nchunks:
            start_gather(c + 1, 1 - slot)          # prefetch next wave behind the LN

        lo, hi = slot * chunk, (slot + 1) * chunk
        w = wbuf[lo:hi, :].astype(jnp.float32)                         # (chunk, H)
        p = pos_ref[c * chunk:(c + 1) * chunk, :].astype(jnp.float32)  # (chunk, H)
        x = w + p
        u = jnp.mean(x, axis=-1, keepdims=True)
        xc = x - u
        var = jnp.mean(xc * xc, axis=-1, keepdims=True)
        y = xc * lax.rsqrt(var + eps)
        y = gamma * y + beta
        out_ref[c * chunk:(c + 1) * chunk, :] = y.astype(out_ref.dtype)
    # TODO(synk): training-mode dropout would need pltpu.prng_seed/prng_random_bits;
    # eval-mode dropout is an identity, which is what we implement here.


def embeddings_forward(input_ids, word_emb, pos_emb, gamma, beta, *,
                       eps=1e-12, out_dtype=jnp.float32):
    B, S = input_ids.shape
    V, H = word_emb.shape
    P, _ = pos_emb.shape
    assert S <= P, "sequence length exceeds max_position_size"

    ts = _pick_token_tile(S)
    chunk = _pick_chunk(ts)
    nt = S // ts

    pos_used = pos_emb[:S]                         # only rows [0, S) are ever read
    gamma2d = gamma.reshape(1, H).astype(jnp.float32)
    beta2d = beta.reshape(1, H).astype(jnp.float32)

    kernel = functools.partial(_emb_layernorm_kernel, eps=eps, ts=ts, chunk=chunk)

    n_tok = B * S
    cost = pl.CostEstimate(
        flops=8 * n_tok * H,
        transcendentals=n_tok,
        bytes_accessed=int(n_tok * H * word_emb.dtype.itemsize       # gathered rows
                           + S * H * pos_emb.dtype.itemsize          # position rows
                           + n_tok * H * jnp.dtype(out_dtype).itemsize  # output
                           + n_tok * 4 + 2 * H * 4),
    )

    grid_spec = pltpu.PrefetchScalarGridSpec(
        num_scalar_prefetch=1,                     # input_ids -> SMEM, drives the gather
        grid=(B, nt),
        in_specs=[
            pl.BlockSpec(memory_space=pl.ANY),                     # word table stays in HBM
            pl.BlockSpec((ts, H), lambda b, t, ids: (t, 0)),       # contiguous pos rows
            pl.BlockSpec((1, H), lambda b, t, ids: (0, 0)),        # gamma (resident)
            pl.BlockSpec((1, H), lambda b, t, ids: (0, 0)),        # beta (resident)
        ],
        out_specs=pl.BlockSpec((None, ts, H), lambda b, t, ids: (b, t, 0)),
        scratch_shapes=[
            pltpu.VMEM((2 * chunk, H), word_emb.dtype),            # double-buffered gather pad
            pltpu.SemaphoreType.DMA((2 * chunk,)),
        ],
    )

    return pl.pallas_call(
        kernel,
        out_shape=jax.ShapeDtypeStruct((B, S, H), out_dtype),
        grid_spec=grid_spec,
        compiler_params=pltpu.CompilerParams(
            dimension_semantics=("parallel", "parallel")),
        cost_estimate=cost,
    )(input_ids.astype(jnp.int32), word_emb, pos_used, gamma2d, beta2d)


def embeddings_reference(input_ids, word_emb, pos_emb, gamma, beta, eps=1e-12):
    B, S = input_ids.shape
    w = word_emb[input_ids].astype(jnp.float32)                     # (B, S, H)
    p = pos_emb[jnp.arange(S)][None, :, :].astype(jnp.float32)      # (1, S, H)
    x = w + p
    u = jnp.mean(x, axis=-1, keepdims=True)
    s = jnp.mean((x - u) ** 2, axis=-1, keepdims=True)
    x = (x - u) / jnp.sqrt(s + eps)
    return gamma * x + beta


if __name__ == "__main__":
    # Module hyperparameters (small, consistent with Embeddings.__init__)
    vocab_size = 64
    hidden_size = 32
    max_position_size = 32
    dropout_rate = 0.1   # identity in inference mode

    B, S = 2, 16         # exercises multi-chunk gather (ts=16, chunk=8, 2 waves)

    key = jax.random.PRNGKey(0)
    k_word, k_pos, k_ids = jax.random.split(key, 3)

    word_emb = jax.random.normal(k_word, (vocab_size, hidden_size), dtype=jnp.float32)
    pos_emb = jax.random.normal(k_pos, (max_position_size, hidden_size), dtype=jnp.float32)
    gamma = jnp.ones((hidden_size,), dtype=jnp.float32)
    beta = jnp.zeros((hidden_size,), dtype=jnp.float32)
    input_ids = jax.random.randint(k_ids, (B, S), 0, vocab_size, dtype=jnp.int32)

    # f32 tables
    out = embeddings_forward(input_ids, word_emb, pos_emb, gamma, beta)
    out = jax.block_until_ready(out)
    ref = embeddings_reference(input_ids, word_emb, pos_emb, gamma, beta)
    np.testing.assert_allclose(np.asarray(out), np.asarray(ref), rtol=1e-5, atol=1e-5)

    # bf16 tables (half the HBM gather/read traffic), LayerNorm still in f32.
    word_bf16 = word_emb.astype(jnp.bfloat16)
    pos_bf16 = pos_emb.astype(jnp.bfloat16)
    out_bf16 = embeddings_forward(input_ids, word_bf16, pos_bf16, gamma, beta)
    out_bf16 = jax.block_until_ready(out_bf16)
    ref_bf16 = embeddings_reference(input_ids,
                                    word_bf16.astype(jnp.float32),
                                    pos_bf16.astype(jnp.float32), gamma, beta)
    np.testing.assert_allclose(np.asarray(out_bf16), np.asarray(ref_bf16),
                               rtol=1e-5, atol=1e-5)

    print("KERNEL_OK")
</pallas_src>

<mosaic_0001>
module attributes {stable_mosaic.version = 11 : i64} {
  func.func @_emb_layernorm_kernel(%arg0: i32, %arg1: i32, %arg2: memref<2x16xi32, #tpu.memory_space<smem>>, %arg3: memref<64x32xf32, #tpu.memory_space<any>>, %arg4: memref<16x32xf32, #tpu.memory_space<vmem>>, %arg5: memref<1x32xf32, #tpu.memory_space<vmem>>, %arg6: memref<1x32xf32, #tpu.memory_space<vmem>>, %arg7: memref<1x16x32xf32, #tpu.memory_space<vmem>>, %arg8: memref<16x32xf32, #tpu.memory_space<vmem>>, %arg9: memref<16x!tpu.dma_semaphore, #tpu.memory_space<semaphore_mem>>) attributes {dimension_semantics = [#tpu.dimension_semantics<parallel>, #tpu.dimension_semantics<parallel>], iteration_bounds = array<i64: 2, 1>, scalar_prefetch = 1 : i64, scratch_operands = 2 : i64, tpu.core_type = #tpu.core_type<tc>, window_params = [{}, {transform_indices = @transform_1, window_bounds = array<i64: 16, 32>}, {pipeline_mode = #tpu.pipeline_mode<synchronous>, transform_indices = @transform_2, window_bounds = array<i64: 1, 32>}, {pipeline_mode = #tpu.pipeline_mode<synchronous>, transform_indices = @transform_3, window_bounds = array<i64: 1, 32>}, {transform_indices = @transform_4, window_bounds = array<i64: 1, 16, 32>}]} {
    %c16_i32 = arith.constant 16 : i32
    %0 = arith.muli %arg1, %c16_i32 : i32
    %c0 = arith.constant 0 : index
    %c0_0 = arith.constant 0 : index
    %1 = vector.load %arg5[%c0, %c0_0] : memref<1x32xf32, #tpu.memory_space<vmem>>, vector<1x32xf32>
    %c0_1 = arith.constant 0 : index
    %c0_2 = arith.constant 0 : index
    %2 = vector.load %arg6[%c0_1, %c0_2] : memref<1x32xf32, #tpu.memory_space<vmem>>, vector<1x32xf32>
    %c0_i32 = arith.constant 0 : i32
    %3 = arith.addi %0, %c0_i32 : i32
    %c0_i32_3 = arith.constant 0 : i32
    %c8_i32 = arith.constant 8 : i32
    %4 = arith.addi %c0_i32_3, %c8_i32 : i32
    %c1_i32 = arith.constant 1 : i32
    scf.for %arg10 = %c0_i32_3 to %4 step %c1_i32  : i32 {
      %c1_i32_40 = arith.constant 1 : i32
      %61 = arith.muli %arg10, %c1_i32_40 : i32
      %c0_i32_41 = arith.constant 0 : i32
      %62 = arith.addi %c0_i32_41, %61 : i32
      %63 = arith.addi %3, %62 : i32
      %64 = arith.index_cast %arg0 : i32 to index
      %65 = arith.index_cast %63 : i32 to index
      %66 = memref.load %arg2[%64, %65] : memref<2x16xi32, #tpu.memory_space<smem>>
      %c0_i32_42 = arith.constant 0 : i32
      %67 = arith.addi %c0_i32_42, %62 : i32
      %c0_i32_43 = arith.constant 0 : i32
      %68 = arith.addi %c0_i32_43, %62 : i32
      %c0_i32_44 = arith.constant 0 : i32
      %69 = tpu.memref_slice %arg3[%66, %c0_i32_44] : memref<64x32xf32, #tpu.memory_space<any>> -> memref<1x32xf32, #tpu.memory_space<any>>
      %70 = tpu.memref_squeeze %69 : memref<1x32xf32, #tpu.memory_space<any>> -> memref<32xf32, #tpu.memory_space<any>>
      %c0_i32_45 = arith.constant 0 : i32
      %71 = tpu.memref_slice %arg8[%67, %c0_i32_45] : memref<16x32xf32, #tpu.memory_space<vmem>> -> memref<1x32xf32, #tpu.memory_space<vmem>>
      %72 = tpu.memref_squeeze %71 : memref<1x32xf32, #tpu.memory_space<vmem>> -> memref<32xf32, #tpu.memory_space<vmem>>
      %73 = tpu.memref_slice %arg9[%68] : memref<16x!tpu.dma_semaphore, #tpu.memory_space<semaphore_mem>> -> memref<1x!tpu.dma_semaphore, #tpu.memory_space<semaphore_mem>>
      %74 = tpu.memref_squeeze %73 : memref<1x!tpu.dma_semaphore, #tpu.memory_space<semaphore_mem>> -> memref<!tpu.dma_semaphore, #tpu.memory_space<semaphore_mem>>
      tpu.enqueue_dma source(%70 : memref<32xf32, #tpu.memory_space<any>>) target(%72 : memref<32xf32, #tpu.memory_space<vmem>>) target_semaphore(%74 : memref<!tpu.dma_semaphore, #tpu.memory_space<semaphore_mem>>)
    }
    %c8_i32_4 = arith.constant 8 : i32
    %c0_i32_5 = arith.constant 0 : i32
    %c8_i32_6 = arith.constant 8 : i32
    %5 = arith.addi %c0_i32_5, %c8_i32_6 : i32
    %c1_i32_7 = arith.constant 1 : i32
    scf.for %arg10 = %c0_i32_5 to %5 step %c1_i32_7  : i32 {
      %c1_i32_40 = arith.constant 1 : i32
      %61 = arith.muli %arg10, %c1_i32_40 : i32
      %c0_i32_41 = arith.constant 0 : i32
      %62 = arith.addi %c0_i32_41, %61 : i32
      %c0_i32_42 = arith.constant 0 : i32
      %63 = arith.addi %c0_i32_42, %62 : i32
      %c0_i32_43 = arith.constant 0 : i32
      %64 = arith.addi %c0_i32_43, %62 : i32
      %c0_i32_44 = arith.constant 0 : i32
      %c0_i32_45 = arith.constant 0 : i32
      %65 = tpu.memref_slice %arg3[%c0_i32_44, %c0_i32_45] : memref<64x32xf32, #tpu.memory_space<any>> -> memref<1x32xf32, #tpu.memory_space<any>>
      %66 = tpu.memref_squeeze %65 : memref<1x32xf32, #tpu.memory_space<any>> -> memref<32xf32, #tpu.memory_space<any>>
      %c0_i32_46 = arith.constant 0 : i32
      %67 = tpu.memref_slice %arg8[%63, %c0_i32_46] : memref<16x32xf32, #tpu.memory_space<vmem>> -> memref<1x32xf32, #tpu.memory_space<vmem>>
      %68 = tpu.memref_squeeze %67 : memref<1x32xf32, #tpu.memory_space<vmem>> -> memref<32xf32, #tpu.memory_space<vmem>>
      %69 = tpu.memref_slice %arg9[%64] : memref<16x!tpu.dma_semaphore, #tpu.memory_space<semaphore_mem>> -> memref<1x!tpu.dma_semaphore, #tpu.memory_space<semaphore_mem>>
      %70 = tpu.memref_squeeze %69 : memref<1x!tpu.dma_semaphore, #tpu.memory_space<semaphore_mem>> -> memref<!tpu.dma_semaphore, #tpu.memory_space<semaphore_mem>>
      tpu.wait_dma2 semaphore(%70 : memref<!tpu.dma_semaphore, #tpu.memory_space<semaphore_mem>>) src(%66 : memref<32xf32, #tpu.memory_space<any>>) dst(%68 : memref<32xf32, #tpu.memory_space<vmem>>)
    }
    %c8_i32_8 = arith.constant 8 : i32
    %c8_i32_9 = arith.constant 8 : i32
    %6 = arith.addi %0, %c8_i32_9 : i32
    %c0_i32_10 = arith.constant 0 : i32
    %c8_i32_11 = arith.constant 8 : i32
    %7 = arith.addi %c0_i32_10, %c8_i32_11 : i32
    %c1_i32_12 = arith.constant 1 : i32
    scf.for %arg10 = %c0_i32_10 to %7 step %c1_i32_12  : i32 {
      %c1_i32_40 = arith.constant 1 : i32
      %61 = arith.muli %arg10, %c1_i32_40 : i32
      %c0_i32_41 = arith.constant 0 : i32
      %62 = arith.addi %c0_i32_41, %61 : i32
      %63 = arith.addi %6, %62 : i32
      %64 = arith.index_cast %arg0 : i32 to index
      %65 = arith.index_cast %63 : i32 to index
      %66 = memref.load %arg2[%64, %65] : memref<2x16xi32, #tpu.memory_space<smem>>
      %c8_i32_42 = arith.constant 8 : i32
      %67 = arith.addi %c8_i32_42, %62 : i32
      %c8_i32_43 = arith.constant 8 : i32
      %68 = arith.addi %c8_i32_43, %62 : i32
      %c0_i32_44 = arith.constant 0 : i32
      %69 = tpu.memref_slice %arg3[%66, %c0_i32_44] : memref<64x32xf32, #tpu.memory_space<any>> -> memref<1x32xf32, #tpu.memory_space<any>>
      %70 = tpu.memref_squeeze %69 : memref<1x32xf32, #tpu.memory_space<any>> -> memref<32xf32, #tpu.memory_space<any>>
      %c0_i32_45 = arith.constant 0 : i32
      %71 = tpu.memref_slice %arg8[%67, %c0_i32_45] : memref<16x32xf32, #tpu.memory_space<vmem>> -> memref<1x32xf32, #tpu.memory_space<vmem>>
      %72 = tpu.memref_squeeze %71 : memref<1x32xf32, #tpu.memory_space<vmem>> -> memref<32xf32, #tpu.memory_space<vmem>>
      %73 = tpu.memref_slice %arg9[%68] : memref<16x!tpu.dma_semaphore, #tpu.memory_space<semaphore_mem>> -> memref<1x!tpu.dma_semaphore, #tpu.memory_space<semaphore_mem>>
      %74 = tpu.memref_squeeze %73 : memref<1x!tpu.dma_semaphore, #tpu.memory_space<semaphore_mem>> -> memref<!tpu.dma_semaphore, #tpu.memory_space<semaphore_mem>>
      tpu.enqueue_dma source(%70 : memref<32xf32, #tpu.memory_space<any>>) target(%72 : memref<32xf32, #tpu.memory_space<vmem>>) target_semaphore(%74 : memref<!tpu.dma_semaphore, #tpu.memory_space<semaphore_mem>>)
    }
    %c8_i32_13 = arith.constant 8 : i32
    %c0_14 = arith.constant 0 : index
    %c0_15 = arith.constant 0 : index
    %8 = vector.load %arg8[%c0_14, %c0_15] : memref<16x32xf32, #tpu.memory_space<vmem>>, vector<8x32xf32>
    %c0_16 = arith.constant 0 : index
    %c0_17 = arith.constant 0 : index
    %9 = vector.load %arg4[%c0_16, %c0_17] : memref<16x32xf32, #tpu.memory_space<vmem>>, vector<8x32xf32>
    %10 = arith.addf %8, %9 : vector<8x32xf32>
    %cst = arith.constant dense<0.000000e+00> : vector<8xf32>
    %11 = vector.multi_reduction <add>, %10, %cst [1] : vector<8x32xf32> to vector<8xf32>
    %12 = vector.shape_cast %11 : vector<8xf32> to vector<8x1xf32>
    %cst_18 = arith.constant 3.200000e+01 : f32
    %13 = vector.broadcast %cst_18 : f32 to vector<8x1xf32>
    %14 = arith.divf %12, %13 : vector<8x1xf32>
    %15 = vector.broadcast %14 : vector<8x1xf32> to vector<8x32xf32>
    %16 = arith.subf %10, %15 : vector<8x32xf32>
    %17 = arith.mulf %16, %16 : vector<8x32xf32>
    %cst_19 = arith.constant dense<0.000000e+00> : vector<8xf32>
    %18 = vector.multi_reduction <add>, %17, %cst_19 [1] : vector<8x32xf32> to vector<8xf32>
    %19 = vector.shape_cast %18 : vector<8xf32> to vector<8x1xf32>
    %cst_20 = arith.constant 3.200000e+01 : f32
    %20 = vector.broadcast %cst_20 : f32 to vector<8x1xf32>
    %21 = arith.divf %19, %20 : vector<8x1xf32>
    %cst_21 = arith.constant 9.99999996E-13 : f32
    %22 = vector.broadcast %cst_21 : f32 to vector<8x1xf32>
    %23 = arith.addf %21, %22 : vector<8x1xf32>
    %24 = math.rsqrt %23 : vector<8x1xf32>
    %25 = vector.broadcast %24 : vector<8x1xf32> to vector<8x32xf32>
    %26 = arith.mulf %16, %25 : vector<8x32xf32>
    %27 = vector.broadcast %1 : vector<1x32xf32> to vector<8x32xf32>
    %28 = arith.mulf %27, %26 : vector<8x32xf32>
    %29 = vector.broadcast %2 : vector<1x32xf32> to vector<8x32xf32>
    %30 = arith.addf %28, %29 : vector<8x32xf32>
    %c0_22 = arith.constant 0 : index
    %c0_23 = arith.constant 0 : index
    %c0_24 = arith.constant 0 : index
    %31 = vector.load %arg7[%c0_22, %c0_23, %c0_24] : memref<1x16x32xf32, #tpu.memory_space<vmem>>, vector<1x8x32xf32>
    %32 = vector.shape_cast %31 : vector<1x8x32xf32> to vector<8x32xf32>
    %33 = vector.shape_cast %30 : vector<8x32xf32> to vector<1x8x32xf32>
    tpu.vector_store %arg7[%c0_22, %c0_23, %c0_24], %33 {strides = array<i32>} : memref<1x16x32xf32, #tpu.memory_space<vmem>>, vector<1x8x32xf32>,
    %c0_i32_25 = arith.constant 0 : i32
    %c8_i32_26 = arith.constant 8 : i32
    %34 = arith.addi %c0_i32_25, %c8_i32_26 : i32
    %c1_i32_27 = arith.constant 1 : i32
    scf.for %arg10 = %c0_i32_25 to %34 step %c1_i32_27  : i32 {
      %c1_i32_40 = arith.constant 1 : i32
      %61 = arith.muli %arg10, %c1_i32_40 : i32
      %c0_i32_41 = arith.constant 0 : i32
      %62 = arith.addi %c0_i32_41, %61 : i32
      %c8_i32_42 = arith.constant 8 : i32
      %63 = arith.addi %c8_i32_42, %62 : i32
      %c8_i32_43 = arith.constant 8 : i32
      %64 = arith.addi %c8_i32_43, %62 : i32
      %c0_i32_44 = arith.constant 0 : i32
      %c0_i32_45 = arith.constant 0 : i32
      %65 = tpu.memref_slice %arg3[%c0_i32_44, %c0_i32_45] : memref<64x32xf32, #tpu.memory_space<any>> -> memref<1x32xf32, #tpu.memory_space<any>>
      %66 = tpu.memref_squeeze %65 : memref<1x32xf32, #tpu.memory_space<any>> -> memref<32xf32, #tpu.memory_space<any>>
      %c0_i32_46 = arith.constant 0 : i32
      %67 = tpu.memref_slice %arg8[%63, %c0_i32_46] : memref<16x32xf32, #tpu.memory_space<vmem>> -> memref<1x32xf32, #tpu.memory_space<vmem>>
      %68 = tpu.memref_squeeze %67 : memref<1x32xf32, #tpu.memory_space<vmem>> -> memref<32xf32, #tpu.memory_space<vmem>>
      %69 = tpu.memref_slice %arg9[%64] : memref<16x!tpu.dma_semaphore, #tpu.memory_space<semaphore_mem>> -> memref<1x!tpu.dma_semaphore, #tpu.memory_space<semaphore_mem>>
      %70 = tpu.memref_squeeze %69 : memref<1x!tpu.dma_semaphore, #tpu.memory_space<semaphore_mem>> -> memref<!tpu.dma_semaphore, #tpu.memory_space<semaphore_mem>>
      tpu.wait_dma2 semaphore(%70 : memref<!tpu.dma_semaphore, #tpu.memory_space<semaphore_mem>>) src(%66 : memref<32xf32, #tpu.memory_space<any>>) dst(%68 : memref<32xf32, #tpu.memory_space<vmem>>)
    }
    %c8_i32_28 = arith.constant 8 : i32
    %c8 = arith.constant 8 : index
    %c0_29 = arith.constant 0 : index
    %35 = vector.load %arg8[%c8, %c0_29] : memref<16x32xf32, #tpu.memory_space<vmem>>, vector<8x32xf32>
    %c8_30 = arith.constant 8 : index
    %c0_31 = arith.constant 0 : index
    %36 = vector.load %arg4[%c8_30, %c0_31] : memref<16x32xf32, #tpu.memory_space<vmem>>, vector<8x32xf32>
    %37 = arith.addf %35, %36 : vector<8x32xf32>
    %cst_32 = arith.constant dense<0.000000e+00> : vector<8xf32>
    %38 = vector.multi_reduction <add>, %37, %cst_32 [1] : vector<8x32xf32> to vector<8xf32>
    %39 = vector.shape_cast %38 : vector<8xf32> to vector<8x1xf32>
    %cst_33 = arith.constant 3.200000e+01 : f32
    %40 = vector.broadcast %cst_33 : f32 to vector<8x1xf32>
    %41 = arith.divf %39, %40 : vector<8x1xf32>
    %42 = vector.broadcast %41 : vector<8x1xf32> to vector<8x32xf32>
    %43 = arith.subf %37, %42 : vector<8x32xf32>
    %44 = arith.mulf %43, %43 : vector<8x32xf32>
    %cst_34 = arith.constant dense<0.000000e+00> : vector<8xf32>
    %45 = vector.multi_reduction <add>, %44, %cst_34 [1] : vector<8x32xf32> to vector<8xf32>
    %46 = vector.shape_cast %45 : vector<8xf32> to vector<8x1xf32>
    %cst_35 = arith.constant 3.200000e+01 : f32
    %47 = vector.broadcast %cst_35 : f32 to vector<8x1xf32>
    %48 = arith.divf %46, %47 : vector<8x1xf32>
    %cst_36 = arith.constant 9.99999996E-13 : f32
    %49 = vector.broadcast %cst_36 : f32 to vector<8x1xf32>
    %50 = arith.addf %48, %49 : vector<8x1xf32>
    %51 = math.rsqrt %50 : vector<8x1xf32>
    %52 = vector.broadcast %51 : vector<8x1xf32> to vector<8x32xf32>
    %53 = arith.mulf %43, %52 : vector<8x32xf32>
    %54 = vector.broadcast %1 : vector<1x32xf32> to vector<8x32xf32>
    %55 = arith.mulf %54, %53 : vector<8x32xf32>
    %56 = vector.broadcast %2 : vector<1x32xf32> to vector<8x32xf32>
    %57 = arith.addf %55, %56 : vector<8x32xf32>
    %c0_37 = arith.constant 0 : index
    %c8_38 = arith.constant 8 : index
    %c0_39 = arith.constant 0 : index
    %58 = vector.load %arg7[%c0_37, %c8_38, %c0_39] : memref<1x16x32xf32, #tpu.memory_space<vmem>>, vector<1x8x32xf32>
    %59 = vector.shape_cast %58 : vector<1x8x32xf32> to vector<8x32xf32>
    %60 = vector.shape_cast %57 : vector<8x32xf32> to vector<1x8x32xf32>
    tpu.vector_store %arg7[%c0_37, %c8_38, %c0_39], %60 {strides = array<i32>} : memref<1x16x32xf32, #tpu.memory_space<vmem>>, vector<1x8x32xf32>,
    return
  }
  func.func @transform_1(%arg0: i32, %arg1: i32, %arg2: memref<2x16xi32, #tpu.memory_space<smem>>) -> (i32, i32) {
    %c0_i32 = arith.constant 0 : i32
    %c0_i32_0 = arith.constant 0 : i32
    return %arg1, %c0_i32 : i32, i32
  }
  func.func @transform_2(%arg0: i32, %arg1: i32, %arg2: memref<2x16xi32, #tpu.memory_space<smem>>) -> (i32, i32) {
    %c0_i32 = arith.constant 0 : i32
    %c0_i32_0 = arith.constant 0 : i32
    %c0_i32_1 = arith.constant 0 : i32
    return %c0_i32, %c0_i32_0 : i32, i32
  }
  func.func @transform_3(%arg0: i32, %arg1: i32, %arg2: memref<2x16xi32, #tpu.memory_space<smem>>) -> (i32, i32) {
    %c0_i32 = arith.constant 0 : i32
    %c0_i32_0 = arith.constant 0 : i32
    %c0_i32_1 = arith.constant 0 : i32
    return %c0_i32, %c0_i32_0 : i32, i32
  }
  func.func @transform_4(%arg0: i32, %arg1: i32, %arg2: memref<2x16xi32, #tpu.memory_space<smem>>) -> (i32, i32, i32) {
    %c0_i32 = arith.constant 0 : i32
    %c0_i32_0 = arith.constant 0 : i32
    return %arg0, %arg1, %c0_i32 : i32, i32, i32
  }
}

</mosaic_0001>

<bundles_post_ra>
// kernel: tpu_custom_call.1
= control target key start
LH: loop header
LB: loop body
LE: loop exit
PB: predicated region body
PF: predicated region fallthrough
CT: control target
= control target key end

     0   :  { %s1098_s0 = inlined_call_operand.vmem [shape: s32[2,16], index: 0, kind: input, shape index: {}]   ;;  %s1099_s1 = inlined_call_operand.vmem [shape: f32[64,32], index: 1, kind: input, shape index: {}]   ;;  %s1100_s2 = inlined_call_operand.vmem [shape: f32[16,32], index: 2, kind: input, shape index: {}]   ;;  %s1101_s3 = inlined_call_operand.vmem [shape: f32[1,32], index: 3, kind: input, shape index: {}]   ;;  %s1102_s4 = inlined_call_operand.vmem [shape: f32[1,32], index: 4, kind: input, shape index: {}]   ;;  %s1103_s5 = inlined_call_operand.hbm [shape: f32[2,16,32], index: 5, kind: output, shape index: {}]  }
   0x1   :  { %s10_s20 = sshll.u32 %s1098_s0, 4  ;;  %s11_s20 = int_to_ptr.vmem [resolvable:$true] %s10_s20 }
   0x2   :  { %s781_s21 = scalar_lea.vmem %s11_s20, 32  ;;  %p786_p1 = scmp.lt.s32.totalorder %s11_s20, %s11_s20 }
   0x3   :  { %p782_p0 = scmp.ne.s32.totalorder %s11_s20, %s781_s21  ;;  %p787_p2 = scmp.lt.s32.totalorder %s781_s21, %s781_s21 }
   0x5   :  { %p788_p3 = por %p787_p2, %p786_p1 }
   0x7   :  { %p789_p4 = pnand %p788_p3, %p782_p0 }
   0x9   :  { %792 = shalt.err (!%p789_p4)  }
   0xa   :  { %s909_s22 = smov [#allocation5]  }
   0xb   :  { %13 = dma.vmem_to_smem %s11_s20, 32, %s909_s22, [#allocation4] }
   0xc   :  { %859 = dma.done.wait [#allocation4], 32 }
   0xd   :  { %860 = vsyncadd [#allocation4], 4294967264 }
   0xe   :  { %15 = sfence }
   0xf   :  { %16 = vsyncpa [#allocation7], 0 }
  0x10   :  { %18 = vsyncpa [#allocation7 + $0x1], 0  ;;  %s946_s23 = smov 0   ;;  %s948_s24 = smov 0  }
  0x11   :  { %s950_s0 = smov 0   ;;  %s952_s25 = smov 0  }
  0x12   :  { %s954_s26 = smov 0   ;;  %s956_s27 = smov 0  }
  0x13 LB: > { %s653_s28 = sadd.s32 4294967295, %s891_s27   ;;  %s654_s29 = sadd.s32 4294967294, %s891_s27   ;;  %s891_s27 = sphi %s956_s27, %s24_s27   ;;  %s887_s26 = sphi %s954_s26, %s1110_s26   ;;  %s883_s25 = sphi %s952_s25, %s1109_s25   ;;  %s879_s0 = sphi %s950_s0, %s1108_s0   ;;  %s875_s24 = sphi %s948_s24, %s1107_s24   ;;  %s871_s23 = sphi %s946_s23, %s1106_s23  }
  0x14   : > { %s36_s30 = sadd.s32 1, %s887_s26  ;;  %s113_s6 = sadd.s32 1, %s879_s0 }
  0x15   : > { %p38_p5 = scmp.ge.s32.totalorder %s36_s30, 2  ;;  %p123_p6 = scmp.ne.s32.totalorder %s879_s0, %s875_s24 }
  0x16   : > { %p124_p7 = scmp.eq.s32.totalorder %s653_s28, 1  ;;  %p129_p8 = scmp.ne.s32.totalorder %s875_s24, %s871_s23 }
  0x17   : > { %s1112_s30 = smov (%p38_p5, %s36_s30), 0  ;;  %p130_p10 = scmp.eq.s32.totalorder %s654_s29, 1 }
  0x18   : > { %p986_p9 = por %p124_p7, %p123_p6  ;;  %s108_s8 = ssub.s32 %s887_s26, %s1112_s30 }
  0x19   : > { %p657_p11 = scmp.ge.s32.totalorder %s891_s27, 1  ;;  %p111_p12 = scmp.eq.s32.totalorder %s108_s8, 0 }
  0x1a   : > { %p993_p13 = por %p130_p10, %p129_p8  ;;  %p163_p0 = scmp.lt.s32.totalorder %s891_s27, 3 }
  0x1b   : > { %s999_s10 = scalar_select %p111_p12, %s879_s0, %s113_s6  }
  0x1c   : > { %p164_p1 = pnand %p657_p11, %p163_p0 }
  0x1d   : > { %s184_s11 = sand.u32 (!%p164_p1), 1, %s875_s24   ;;  %s893_s18 = smov (!%p164_p1), 0  }
  0x1e   : > { %167 = sbr.rel (%p164_p1) target bundleno = 731 (0x2db), region = 32  ;;  %s658_s16 = sshll.u32 (!%p164_p1), %s184_s11, 4 }
  0x1f   : > { %s1014_s17 = scalar_lea.vmem (!%p164_p1), [#allocation6], %s658_s16 }
  0x23   : > { %v1005_v0 = vld [vmem:[%s1101_s3] ss:$0 sm:$0xff] }
  0x24   : > { %v1010_v1 = vld [vmem:[%s1102_s4] ss:$0 sm:$0xff] }
  0x25 LB: >> { %s204_s19 = sshra.s32 %s895_s18, 7  ;;  %s209_s20 = sand.u32 127, %s895_s18  ;;  %s895_s18 = sphi %s893_s18, %s202_s18  }
  0x26   : >> { %s206_s21 = sadd.s32 %s883_s25, %s204_s19  ;;  %s213_s13 = scalar_lea.vmem [#allocation2], %s895_s18 }
  0x27   : >> { %s659_s22 = sshll.u32 %s206_s21, 7  ;;  %s214_s14 = scalar_lea.sflag [#allocation3], %s895_s18 }
  0x28   : >> { %s210_s28 = sadd.s32 %s659_s22, %s209_s20 }
  0x29   : >> { %s211_s29 = sld [smem:[#allocation5 + %s210_s28]] }
  0x2f   : >> { %s212_s12 = scalar_lea.vmem %s1099_s1, %s211_s29 }
  0x30   : >> { %v233_v2 = vld [vmem:[%s212_s12] sm:$0x1] }
  0x31   : >> { %234 = vst [vmem:[%s213_s13] sm:$0x1] %v233_v2 }
  0x32   : >> { %260 = vsyncadd %s214_s14, 16  ;;  %s202_s18 = sadd.s32 1, %s895_s18  }
  0x33   : >> { %p199_p2 = scmp.ge.s32.totalorder %s202_s18, 8  }
  0x34   : > { %s897_s15 = smov (%p199_p2), 0  }
  0x35   : > { %201 = sbr.rel (!%p199_p2) target bundleno = 37 (0x25), region = 198 }
  0x3a LB: >> { %s267_s16 = scalar_lea.sflag [#allocation3], %s899_s15  ;;  %s899_s15 = sphi %s897_s15, %s266_s15  }
  0x3b   : >> { %861 = dma.done.wait %s267_s16, 16 }
  0x3c   : >> { %862 = vsyncadd %s267_s16, 4294967280  ;;  %s266_s15 = sadd.s32 1, %s899_s15  }
  0x3d   : >> { %p263_p3 = scmp.ge.s32.totalorder %s266_s15, 8  }
  0x3e   : > { %s901_s19 = smov (%p263_p3), 0  }
  0x3f   : > { %265 = sbr.rel (!%p263_p3) target bundleno = 58 (0x3a), region = 209 }
  0x44 LB: >> { %s277_s20 = sadd.s32 8, %s903_s19  ;;  %s567_s29 = scalar_lea.sflag [#allocation3], %s903_s19  ;;  %s903_s19 = sphi %s901_s19, %s276_s19  }
  0x45   : >> { %s278_s21 = sshra.s32 %s277_s20, 7  ;;  %s283_s18 = sand.u32 127, %s277_s20 }
  0x46   : >> { %s280_s22 = sadd.s32 %s883_s25, %s278_s21  ;;  %s568_s6 = scalar_lea.sflag %s567_s29, 8 [#allocation3] }
  0x47   : >> { %s660_s28 = sshll.u32 %s280_s22, 7  ;;  %s565_s15 = scalar_lea.vmem [#allocation2], %s903_s19 }
  0x48   : >> { %s284_s8 = sadd.s32 %s660_s28, %s283_s18 }
  0x49   : >> { %s285_s12 = sld [smem:[#allocation5 + %s284_s8]] }
  0x4f   : >> { %s287_s16 = scalar_lea.vmem %s1099_s1, %s285_s12 }
  0x50   : >> { %v308_v3 = vld [vmem:[%s287_s16] sm:$0x1] }
  0x51   : >> { %662 = vst [vmem:[%s565_s15 + $0x8] sm:$0x1] %v308_v3 }
  0x52   : >> { %335 = vsyncadd %s568_s6, 16  ;;  %s276_s19 = sadd.s32 1, %s903_s19  }
  0x53   : >> { %p273_p4 = scmp.ge.s32.totalorder %s276_s19, 8  }
  0x54   : > { %v337_v5 = vld [vmem:[%s1100_s2] sm:$0xff] (%p273_p4)  ;;  %vm339_vm0 = vcmask (%p273_p4), 261120   ;;  %s905_s19 = smov (%p273_p4), 0  }
  0x55   : > { %275 = sbr.rel (!%p273_p4) target bundleno = 68 (0x44), region = 220 }
  0x58   : > { %v336_v4 = vld [vmem:[#allocation2] sm:$0xff] (%p273_p4) }
  0x59   : > { %v338_v6 = vadd.f32 (%p273_p4), %v337_v5, %v336_v4 }
  0x5b   : > { %v340_v7 = vsel %vm339_vm0, %v338_v6, 0.0 }
  0x5c   : > { %341 = vadd.xlane.f32.xlu0 %v340_v7 }
  0xe5   : > { %v342_v8 = vpop.xlane.xlu0 %341 }
  0xe6   : > { %v344_v9 = vmul.f32 0.03125, %v342_v8 }
  0xe8   : > { %v345_v10 = vsub.f32 %v338_v6, %v344_v9 }
  0xea   : > { %v346_v11 = vmul.f32 %v345_v10, %v345_v10 }
  0xec   : > { %v347_v12 = vsel %vm339_vm0, %v346_v11, 0.0 }
  0xed   : > { %348 = vadd.xlane.f32.xlu0 %v347_v12 }
 0x176   : > { %v349_v13 = vpop.xlane.xlu0 %348 }
 0x177   : > { %v350_v14 = vmul.f32 0.03125, %v349_v13 }
 0x179   : > { %v351_v15 = vadd.f32 1e-12, %v350_v14 }
 0x17b   : > { %777 = vrsqrt.f32 %v351_v15 }
 0x188   : > { %v778_v16 = vpop.eup %777 }
 0x189   : > { %v353_v17 = vmul.f32 %v778_v16, %v345_v10 }
 0x18b   : > { %v360_v18 = vmul.f32 %v1005_v0, %v353_v17 }
 0x18d   : > { %v367_v19 = vadd.f32 %v1010_v1, %v360_v18 }
 0x18f   : > { %368 = vst.msk [vmem:[%s1014_s17] sm:$0xff] %vm339_vm0, %v367_v19 }
 0x190 LB: >> { %s572_s18 = scalar_lea.sflag [#allocation3], %s907_s19  ;;  %s907_s19 = sphi %s905_s19, %s374_s19  }
 0x191   : >> { %s573_s22 = scalar_lea.sflag %s572_s18, 8 [#allocation3] }
 0x192   : >> { %863 = dma.done.wait %s573_s22, 16 }
 0x193   : >> { %864 = vsyncadd %s573_s22, 4294967280  ;;  %s374_s19 = sadd.s32 1, %s907_s19  }
 0x194   : >> { %p371_p5 = scmp.ge.s32.totalorder %s374_s19, 8  }
 0x195   : > { %v379_v20 = vld [vmem:[#allocation2 + $0x8] sm:$0xff] (%p371_p5)  ;;  %s686_s6 = sshll.u32 (%p371_p5), %s883_s25, 8  ;;  %s414_s8 = sshll.u32 (%p371_p5), %s1014_s17, 4  ;;  %s1046_s8 = int_to_ptr.vmem [resolvable:$true] %s414_s8 }
 0x196   : > { %373 = sbr.rel (!%p371_p5) target bundleno = 400 (0x190), region = 231  ;;  %v380_v21 = vld [vmem:[%s1100_s2 + $0x8] sm:$0xff] (%p371_p5)  ;;  %s1044_s14 = scalar_lea.hbm (%p371_p5), %s1103_s5, %s686_s6 }
 0x197   : > { %v381_v22 = vadd.f32 (%p371_p5), %v380_v21, %v379_v20  ;;  %s1053_s16 = scalar_lea.sflag (%p371_p5), [#allocation7], %s184_s11  ;;  %s793_s25 = scalar_lea.vmem (%p371_p5), %s1046_s8, 256 }
 0x198   : > { %p794_p6 = scmp.ne.s32.totalorder (%p371_p5), %s1046_s8, %s793_s25  ;;  %s910_s15 = smov (%p371_p5), [#allocation6]  }
 0x199   : > { %v382_v23 = vsel (%p371_p5), %vm339_vm0, %v381_v22, 0.0  ;;  %s797_s20 = sshll.u32 (%p371_p5), %s910_s15, 4  ;;  %s798_s20 = int_to_ptr.vmem [resolvable:$false] %s797_s20 }
 0x19a   : > { %383 = vadd.xlane.f32.xlu0 (%p371_p5), %v382_v23  ;;  %p795_p7 = pnand (%p371_p5), %p794_p6, %p986_p9  ;;  %s799_s21 = scalar_lea.vmem (%p371_p5), %s798_s20, 512 }
 0x19b   : > { %p800_p10 = scmp.lt.s32.totalorder %s1046_s8, %s798_s20  ;;  %p801_p11 = scmp.lt.s32.totalorder %s799_s21, %s793_s25 }
 0x19c   : > { %p796_p8 = pneg %p795_p7 }
 0x19d   : > { %p802_p12 = por %p801_p11, %p800_p10 }
 0x19f   : > { %p803_p0 = pnand %p802_p12, %p796_p8 }
 0x223   : > { %v384_v24 = vpop.xlane.xlu0 %383 }
 0x224   : > { %v385_v25 = vmul.f32 0.03125, %v384_v24 }
 0x226   : > { %v386_v26 = vsub.f32 %v381_v22, %v385_v25 }
 0x228   : > { %v387_v27 = vmul.f32 %v386_v26, %v386_v26 }
 0x22a   : > { %v388_v28 = vsel %vm339_vm0, %v387_v27, 0.0 }
 0x22b   : > { %389 = vadd.xlane.f32.xlu0 %v388_v28 }
 0x2b4   : > { %v390_v29 = vpop.xlane.xlu0 %389 }
 0x2b5   : > { %v391_v30 = vmul.f32 0.03125, %v390_v29 }
 0x2b7   : > { %v392_v31 = vadd.f32 1e-12, %v391_v30 }
 0x2b9   : > { %779 = vrsqrt.f32 %v392_v31 }
 0x2c6   : > { %v780_v32 = vpop.eup %779 }
 0x2c7   : > { %v394_v33 = vmul.f32 %v780_v32, %v386_v26 }
 0x2c9   : > { %v395_v34 = vmul.f32 %v1005_v0, %v394_v33 }
 0x2cb   : > { %v396_v35 = vadd.f32 %v1010_v1, %v395_v34 }
 0x2cd   : > { %397 = vst.msk [vmem:[%s1014_s17 + $0x8] sm:$0xff] %vm339_vm0, %v396_v35 }
 0x2ce   : > { %806 = shalt.err (!%p803_p0)
}
 0x2cf   : > { %s807_s11 = scalar_lea.hbm %s1044_s14, 256  ;;  %s811_s18 = scalar_lea.hbm %s1103_s5, 512 }
 0x2d0   : > { %p808_p1 = scmp.ne.s32.totalorder %s1044_s14, %s807_s11  ;;  %p812_p4 = scmp.lt.s32.totalorder %s1044_s14, %s1103_s5 }
 0x2d1   : > { %p813_p5 = scmp.lt.s32.totalorder %s811_s18, %s807_s11 }
 0x2d2   : > { %p809_p2 = pnand %p808_p1, %p986_p9 }
 0x2d3   : > { %p814_p6 = por %p813_p5, %p812_p4 }
 0x2d4   : > { %p810_p3 = pneg %p809_p2 }
 0x2d6   : > { %p815_p7 = pnand %p814_p6, %p810_p3 }
 0x2d8   : > { %818 = shalt.err (!%p815_p7)
}
 0x2d9   : > { %s911_s29 = smov 128   ;;  %s912_s6 = smov 8  }
 0x2da   : > { %687 = dma.vmem_to_hbm [thread:$0]  (%p986_p9), %s1046_s8, 256, %s1044_s14, %s1053_s16, %s911_s29, %s911_s29, %s912_s6  }
 0x2db PF: > { %p693_p8 = scmp.ge.s32.totalorder %s891_s27, 2  ;;  %s429_s12 = sand.u32 1, %s871_s23  }
 0x2dc   : > { %s430_s13 = scalar_lea.sflag [#allocation7], %s429_s12 }
 0x2dd   : > { %p690_p10 = pnand %p693_p8, %p993_p13 }
 0x2df   : > { %p691_p11 = pneg %p690_p10 }
 0x2e1   : > { %866 = dma.done.wait (%p691_p11), %s430_s13, 256  }
 0x2e2   : > { %868 = vsyncadd (%p691_p11), %s430_s13, 4294967040  ;;  %s24_s27 = sadd.s32 1, %s891_s27   ;;  %s1106_s23 = smov %s875_s24 }
 0x2e3   : > { %p21_p12 = scmp.ge.s32.totalorder %s24_s27, 4   ;;  %s1107_s24 = smov %s879_s0 }
 0x2e4   : > { %s1108_s0 = smov %s999_s10  ;;  %s1109_s25 = smov %s887_s26 }
 0x2e5   : > { %s1110_s26 = smov %s1112_s30  ;;  %23 = sbr.rel (!%p21_p12) target bundleno = 19 (0x13), region = 242 }
 0x2ea   :  { %435 = vsyncpa [#allocation7], 1 }
 0x2eb   :  { %437 = vsyncpa [#allocation7 + $0x1], 1 }
 0x2ec   :  { %438 = vsyncmov [#allocation3] }
 0x2ef   :  { %s439_s7 = vpop.sfrf %438 }
 0x2f0   :  { %p670_p9 = scmp.ne.s32.totalorder %s439_s7, 0 }
 0x2f2   :  { %443 = shalt.err (%p670_p9)  }
 0x2f3   :  { %445 = vsyncmov [#allocation3 + $0x1] }
 0x2f6   :  { %s446_s9 = vpop.sfrf %445 }
 0x2f7   :  { %p671_p13 = scmp.ne.s32.totalorder %s446_s9, 0 }
 0x2f9   :  { %450 = shalt.err (%p671_p13)  }
 0x2fa   :  { %452 = vsyncmov [#allocation3 + $0x2] }
 0x2fd   :  { %s453_s8 = vpop.sfrf %452 }
 0x2fe   :  { %p672_p0 = scmp.ne.s32.totalorder %s453_s8, 0 }
 0x300   :  { %457 = shalt.err (%p672_p0)  }
 0x301   :  { %459 = vsyncmov [#allocation3 + $0x3] }
 0x304   :  { %s460_s10 = vpop.sfrf %459 }
 0x305   :  { %p673_p1 = scmp.ne.s32.totalorder %s460_s10, 0 }
 0x307   :  { %464 = shalt.err (%p673_p1)  }
 0x308   :  { %466 = vsyncmov [#allocation3 + $0x4] }
 0x30b   :  { %s467_s27 = vpop.sfrf %466 }
 0x30c   :  { %p674_p2 = scmp.ne.s32.totalorder %s467_s27, 0 }
 0x30e   :  { %471 = shalt.err (%p674_p2)  }
 0x30f   :  { %473 = vsyncmov [#allocation3 + $0x5] }
 0x312   :  { %s474_s1 = vpop.sfrf %473 }
 0x313   :  { %p675_p3 = scmp.ne.s32.totalorder %s474_s1, 0 }
 0x315   :  { %478 = shalt.err (%p675_p3)  }
 0x316   :  { %480 = vsyncmov [#allocation3 + $0x6] }
 0x319   :  { %s481_s2 = vpop.sfrf %480 }
 0x31a   :  { %p676_p4 = scmp.ne.s32.totalorder %s481_s2, 0 }
 0x31c   :  { %485 = shalt.err (%p676_p4)  }
 0x31d   :  { %487 = vsyncmov [#allocation3 + $0x7] }
 0x320   :  { %s488_s3 = vpop.sfrf %487 }
 0x321   :  { %p677_p5 = scmp.ne.s32.totalorder %s488_s3, 0 }
 0x323   :  { %492 = shalt.err (%p677_p5)  }
 0x324   :  { %494 = vsyncmov [#allocation3 + $0x8] }
 0x327   :  { %s495_s4 = vpop.sfrf %494 }
 0x328   :  { %p678_p6 = scmp.ne.s32.totalorder %s495_s4, 0 }
 0x32a   :  { %499 = shalt.err (%p678_p6)  }
 0x32b   :  { %501 = vsyncmov [#allocation3 + $0x9] }
 0x32e   :  { %s502_s5 = vpop.sfrf %501 }
 0x32f   :  { %p679_p7 = scmp.ne.s32.totalorder %s502_s5, 0 }
 0x331   :  { %506 = shalt.err (%p679_p7)  }
 0x332   :  { %508 = vsyncmov [#allocation3 + $0xa] }
 0x335   :  { %s509_s23 = vpop.sfrf %508 }
 0x336   :  { %p680_p8 = scmp.ne.s32.totalorder %s509_s23, 0 }
 0x338   :  { %513 = shalt.err (%p680_p8)  }
 0x339   :  { %515 = vsyncmov [#allocation3 + $0xb] }
 0x33c   :  { %s516_s24 = vpop.sfrf %515 }
 0x33d   :  { %p681_p10 = scmp.ne.s32.totalorder %s516_s24, 0 }
 0x33f   :  { %520 = shalt.err (%p681_p10)  }
 0x340   :  { %522 = vsyncmov [#allocation3 + $0xc] }
 0x343   :  { %s523_s0 = vpop.sfrf %522 }
 0x344   :  { %p682_p11 = scmp.ne.s32.totalorder %s523_s0, 0 }
 0x346   :  { %527 = shalt.err (%p682_p11)  }
 0x347   :  { %529 = vsyncmov [#allocation3 + $0xd] }
 0x34a   :  { %s530_s26 = vpop.sfrf %529 }
 0x34b   :  { %p683_p12 = scmp.ne.s32.totalorder %s530_s26, 0 }
 0x34d   :  { %534 = shalt.err (%p683_p12)  }
 0x34e   :  { %536 = vsyncmov [#allocation3 + $0xe] }
 0x351   :  { %s537_s30 = vpop.sfrf %536 }
 0x352   :  { %p684_p9 = scmp.ne.s32.totalorder %s537_s30, 0 }
 0x354   :  { %541 = shalt.err (%p684_p9)  }
 0x355   :  { %543 = vsyncmov [#allocation3 + $0xf] }
 0x358   :  { %s544_s14 = vpop.sfrf %543 }
 0x359   :  { %p685_p13 = scmp.ne.s32.totalorder %s544_s14, 0 }
 0x35b   :  { %548 = shalt.err (%p685_p13)  }

</bundles_post_ra>
